<compile_context>
chip_gen: v7x
topology: tpu7x:2x2x1
jax: 0.10.0
libtpu: 0.0.40
codegen_flags: <defaults>
</compile_context>

<pallas_src>
import functools

import jax
import jax.numpy as jnp
from jax.experimental import pallas as pl
from jax.experimental.pallas import tpu as pltpu


def _conv_lrelu_kernel(x_main_ref, x_halo_ref, w_ref, b_ref, o_ref, acc_ref,
                       *, kh_taps, negative_slope):
    # x_main_ref: (1, TH, Wp*Cin)   packed padded rows [i*TH, i*TH + TH)
    # x_halo_ref: (1, 8,  Wp*Cin)   packed padded rows [i*TH + TH, i*TH + TH + 8)
    # w_ref:      (KH, Wp*Cin, W*Cout)  block-banded weights (KW, Cin folded in)
    # b_ref:      (1, W*Cout)
    # o_ref:      (1, TH, W*Cout)
    # acc_ref:    (TH, W*Cout) f32 scratch
    th = o_ref.shape[1]

    # Init the accumulator with the broadcast bias (saves one VPU add pass).
    acc_ref[...] = jnp.broadcast_to(b_ref[...], acc_ref.shape).astype(jnp.float32)

    x_main = x_main_ref[0]                                   # (TH, K)
    x_halo = x_halo_ref[0]                                   # (8,  K)
    # Tile-aligned concat (TH is a multiple of 8) -> rows [0, TH+8) of the
    # padded image for this block.
    x_rows = jnp.concatenate([x_main, x_halo], axis=0)       # (TH+8, K)

    # One matmul per KH tap; KW and Cin are already folded into K = Wp*Cin.
    # NOTE: operands kept in f32 to match PyTorch Conv2d numerics exactly;
    # flip to bf16 operands (f32 accumulate) when channels are large enough
    # to be MXU-bound on v6e/v7x.
    for kh in range(kh_taps):
        win = x_rows[kh:kh + th, :]                          # static slice
        acc_ref[...] += jnp.dot(win, w_ref[kh],
                                preferred_element_type=jnp.float32)

    y = acc_ref[...]
    o_ref[0] = jnp.where(y >= 0, y, negative_slope * y).astype(o_ref.dtype)


def _pick_row_block(h, target_rows=64):
    """Largest multiple-of-8 divisor of h, capped at target_rows.

    target_rows caps the per-step VMEM footprint: double-buffered input +
    output is roughly 2 * TH * (Wp*Cin + W*Cout) * 4 bytes — keep it well
    under the scoped VMEM default (16 MiB v5e, 32 MiB v6e/v7x; 64 MiB
    physical on v7x).
    """
    best = None
    for cand in range(8, min(h, target_rows) + 1, 8):
        if h % cand == 0:
            best = cand
    return best


def conv_leaky_relu2d(x_nchw, weight_oihw, bias, *, padding=1,
                      negative_slope=0.2):
    """Forward pass of ConvLeakyRelu2d.

    x_nchw:      (N, Cin, H, W)
    weight_oihw: (Cout, Cin, KH, KW)   (PyTorch Conv2d layout)
    bias:        (Cout,)
    returns      (N, Cout, H, W)       (stride=1, dilation=1, groups=1)
    """
    N, Cin, H, W = x_nchw.shape
    Cout, cin_w, KH, KW = weight_oihw.shape
    assert cin_w == Cin
    assert padding == 1 and KH == 3 and KW == 3, "kernel specialized to 3x3/pad=1"
    # TODO(synk): generalize row blocking to H not divisible by 8 (pad + mask),
    # and add a channels-on-lanes path for large Cin/Cout where W*Cout no
    # longer fits the lane-folded formulation.
    assert H % 8 == 0, "row-block tiling assumes H % 8 == 0"

    TH = _pick_row_block(H)              # output rows per grid step
    Wp = W + 2 * padding
    K = Wp * Cin                         # contraction depth per KH tap
    WCout = W * Cout                     # lane-dense output width

    # ---- glue (plain JAX; XLA fuses transpose+pad+reshape into ~one pass) ---
    # TODO(synk): the NCHW -> packed-row layout change (and the inverse on the
    # output) are still wrapper XLA passes; fully folding them into the kernel
    # needs an in-kernel minor-dim transpose or a gather DMA.
    x_nhwc = jnp.transpose(x_nchw, (0, 2, 3, 1))             # (N, H, W, Cin)
    # Rows: 1 top pad + H data + 1 bottom pad + (TH-2) extra zero rows so the
    # 8-row halo alias below never indexes out of bounds.  Hpad = H + TH.
    x_pad = jnp.pad(x_nhwc, ((0, 0), (1, TH - 1), (1, 1), (0, 0)))
    x_packed = x_pad.reshape(N, H + TH, K)

    # Block-banded weights:
    #   Wmat[kh, p*Cin+ci, w*Cout+co] = weight[co, ci, kh, p-w]  if 0<=p-w<KW
    # so a single (TH, K) @ (K, W*Cout) matmul per kh does the entire
    # W-direction convolution and the Cin contraction at once.
    w_hwio = jnp.transpose(weight_oihw, (2, 3, 1, 0))        # (KH, KW, Cin, Cout)
    p_idx = jnp.arange(Wp)[:, None]
    w_idx = jnp.arange(W)[None, :]
    kw_idx = p_idx - w_idx                                   # (Wp, W)
    valid = (kw_idx >= 0) & (kw_idx < KW)
    gathered = w_hwio[:, jnp.clip(kw_idx, 0, KW - 1)]        # (KH, Wp, W, Cin, Cout)
    gathered = jnp.where(valid[None, :, :, None, None], gathered, 0.0)
    w_banded = jnp.transpose(gathered, (0, 1, 3, 2, 4)).reshape(KH, K, WCout)
    w_banded = w_banded.astype(jnp.float32)

    bias_row = jnp.tile(bias.astype(jnp.float32), W).reshape(1, WCout)

    kernel = functools.partial(_conv_lrelu_kernel, kh_taps=KH,
                               negative_slope=negative_slope)

    out_packed = pl.pallas_call(
        kernel,
        out_shape=jax.ShapeDtypeStruct((N, H, WCout), x_nchw.dtype),
        grid=(N, H // TH),
        in_specs=[
            # main TH packed rows of this block
            pl.BlockSpec((1, TH, K), lambda n, i: (n, i, 0)),
            # 2-row halo, delivered as the next 8-row-aligned chunk of the
            # same packed array (8 | TH, so the blocked index is exact)
            pl.BlockSpec((1, 8, K), lambda n, i: (n, (i + 1) * (TH // 8), 0)),
            # banded weights + bias: constant block index -> fetched once,
            # stays resident in VMEM across the whole grid
            pl.BlockSpec((KH, K, WCout), lambda n, i: (0, 0, 0)),
            pl.BlockSpec((1, WCout), lambda n, i: (0, 0)),
        ],
        out_specs=pl.BlockSpec((1, TH, WCout), lambda n, i: (n, i, 0)),
        scratch_shapes=[pltpu.VMEM((TH, WCout), jnp.float32)],
        compiler_params=pltpu.CompilerParams(
            dimension_semantics=("parallel", "parallel")),
    )(x_packed, x_packed, w_banded, bias_row)

    out_nhwc = out_packed.reshape(N, H, W, Cout)
    return jnp.transpose(out_nhwc, (0, 3, 1, 2))


if __name__ == "__main__":
    key = jax.random.PRNGKey(0)
    kx, kw, kb = jax.random.split(key, 3)

    N, Cin, H, W = 2, 4, 16, 16
    Cout, KH, KW = 8, 3, 3

    x = jax.random.normal(kx, (N, Cin, H, W), dtype=jnp.float32)

    # Deterministic Conv2d-style init (uniform in +/- 1/sqrt(fan_in)).
    fan_in = Cin * KH * KW
    bound = 1.0 / (fan_in ** 0.5)
    weight = jax.random.uniform(kw, (Cout, Cin, KH, KW), dtype=jnp.float32,
                                minval=-bound, maxval=bound)
    bias = jax.random.uniform(kb, (Cout,), dtype=jnp.float32,
                              minval=-bound, maxval=bound)

    out = conv_leaky_relu2d(x, weight, bias, padding=1)
    out = jax.block_until_ready(out)

    # Reference check with XLA conv (same semantics as F.conv2d + leaky_relu).
    ref = jax.lax.conv_general_dilated(
        x, weight, window_strides=(1, 1), padding=((1, 1), (1, 1)),
        dimension_numbers=("NCHW", "OIHW", "NCHW"),
    ) + bias.reshape(1, Cout, 1, 1)
    ref = jnp.where(ref >= 0, ref, 0.2 * ref)

    assert out.shape == (N, Cout, H, W)
    assert jnp.allclose(out, ref, rtol=1e-5, atol=1e-5), "mismatch vs reference"

    print("KERNEL_OK")
</pallas_src>

<mosaic_0001>
module attributes {stable_mosaic.version = 11 : i64} {
  func.func @_conv_lrelu_kernel(%arg0: i32, %arg1: i32, %arg2: memref<1x16x72xf32, #tpu.memory_space<vmem>>, %arg3: memref<1x8x72xf32, #tpu.memory_space<vmem>>, %arg4: memref<3x72x128xf32, #tpu.memory_space<vmem>>, %arg5: memref<1x128xf32, #tpu.memory_space<vmem>>, %arg6: memref<1x16x128xf32, #tpu.memory_space<vmem>>, %arg7: memref<16x128xf32, #tpu.memory_space<vmem>>) attributes {dimension_semantics = [#tpu.dimension_semantics<parallel>, #tpu.dimension_semantics<parallel>], iteration_bounds = array<i64: 2, 1>, scalar_prefetch = 0 : i64, scratch_operands = 1 : i64, tpu.core_type = #tpu.core_type<tc>, window_params = [{transform_indices = @transform_0, window_bounds = array<i64: 1, 16, 72>}, {transform_indices = @transform_1, window_bounds = array<i64: 1, 8, 72>}, {pipeline_mode = #tpu.pipeline_mode<synchronous>, transform_indices = @transform_2, window_bounds = array<i64: 3, 72, 128>}, {pipeline_mode = #tpu.pipeline_mode<synchronous>, transform_indices = @transform_3, window_bounds = array<i64: 1, 128>}, {transform_indices = @transform_4, window_bounds = array<i64: 1, 16, 128>}]} {
    %c0 = arith.constant 0 : index
    %c0_0 = arith.constant 0 : index
    %0 = vector.load %arg5[%c0, %c0_0] : memref<1x128xf32, #tpu.memory_space<vmem>>, vector<1x128xf32>
    %1 = vector.shape_cast %0 : vector<1x128xf32> to vector<1x128xf32>
    %2 = vector.broadcast %1 : vector<1x128xf32> to vector<16x128xf32>
    %c0_1 = arith.constant 0 : index
    %c0_2 = arith.constant 0 : index
    %3 = vector.load %arg7[%c0_1, %c0_2] : memref<16x128xf32, #tpu.memory_space<vmem>>, vector<16x128xf32>
    tpu.vector_store %arg7[%c0_1, %c0_2], %2 {strides = array<i32>} : memref<16x128xf32, #tpu.memory_space<vmem>>, vector<16x128xf32>,
    %c0_3 = arith.constant 0 : index
    %c0_4 = arith.constant 0 : index
    %c0_5 = arith.constant 0 : index
    %4 = vector.load %arg2[%c0_3, %c0_4, %c0_5] : memref<1x16x72xf32, #tpu.memory_space<vmem>>, vector<1x16x72xf32>
    %5 = vector.shape_cast %4 : vector<1x16x72xf32> to vector<16x72xf32>
    %c0_6 = arith.constant 0 : index
    %c0_7 = arith.constant 0 : index
    %c0_8 = arith.constant 0 : index
    %6 = vector.load %arg3[%c0_6, %c0_7, %c0_8] : memref<1x8x72xf32, #tpu.memory_space<vmem>>, vector<1x8x72xf32>
    %7 = vector.shape_cast %6 : vector<1x8x72xf32> to vector<8x72xf32>
    %8 = tpu.concatenate %5, %7 in 0 : vector<16x72xf32>, vector<8x72xf32> -> vector<24x72xf32>
    %9 = vector.extract_strided_slice %8 {offsets = [0, 0], sizes = [16, 72], strides = [1, 1]} : vector<24x72xf32> to vector<16x72xf32>
    %c0_9 = arith.constant 0 : index
    %c0_10 = arith.constant 0 : index
    %10 = vector.load %arg7[%c0_9, %c0_10] : memref<16x128xf32, #tpu.memory_space<vmem>>, vector<16x128xf32>
    %c0_11 = arith.constant 0 : index
    %c0_12 = arith.constant 0 : index
    %c0_13 = arith.constant 0 : index
    %11 = vector.load %arg4[%c0_11, %c0_12, %c0_13] : memref<3x72x128xf32, #tpu.memory_space<vmem>>, vector<1x72x128xf32>
    %12 = vector.shape_cast %11 : vector<1x72x128xf32> to vector<72x128xf32>
    %cst = arith.constant dense<0.000000e+00> : vector<16x128xf32>
    %13 = tpu.matmul %9, %12, %cst {dimension_numbers = #tpu.dot_dimension_numbers<[1], [0], [0], [1], [0, 0, 1, 1], [], []>} : vector<16x72xf32>, vector<72x128xf32>, vector<16x128xf32> -> vector<16x128xf32>
    %14 = arith.addf %10, %13 : vector<16x128xf32>
    %c0_14 = arith.constant 0 : index
    %c0_15 = arith.constant 0 : index
    %15 = vector.load %arg7[%c0_14, %c0_15] : memref<16x128xf32, #tpu.memory_space<vmem>>, vector<16x128xf32>
    tpu.vector_store %arg7[%c0_14, %c0_15], %14 {strides = array<i32>} : memref<16x128xf32, #tpu.memory_space<vmem>>, vector<16x128xf32>,
    %16 = vector.extract_strided_slice %8 {offsets = [1, 0], sizes = [16, 72], strides = [1, 1]} : vector<24x72xf32> to vector<16x72xf32>
    %c0_16 = arith.constant 0 : index
    %c0_17 = arith.constant 0 : index
    %17 = vector.load %arg7[%c0_16, %c0_17] : memref<16x128xf32, #tpu.memory_space<vmem>>, vector<16x128xf32>
    %c1 = arith.constant 1 : index
    %c0_18 = arith.constant 0 : index
    %c0_19 = arith.constant 0 : index
    %18 = vector.load %arg4[%c1, %c0_18, %c0_19] : memref<3x72x128xf32, #tpu.memory_space<vmem>>, vector<1x72x128xf32>
    %19 = vector.shape_cast %18 : vector<1x72x128xf32> to vector<72x128xf32>
    %cst_20 = arith.constant dense<0.000000e+00> : vector<16x128xf32>
    %20 = tpu.matmul %16, %19, %cst_20 {dimension_numbers = #tpu.dot_dimension_numbers<[1], [0], [0], [1], [0, 0, 1, 1], [], []>} : vector<16x72xf32>, vector<72x128xf32>, vector<16x128xf32> -> vector<16x128xf32>
    %21 = arith.addf %17, %20 : vector<16x128xf32>
    %c0_21 = arith.constant 0 : index
    %c0_22 = arith.constant 0 : index
    %22 = vector.load %arg7[%c0_21, %c0_22] : memref<16x128xf32, #tpu.memory_space<vmem>>, vector<16x128xf32>
    tpu.vector_store %arg7[%c0_21, %c0_22], %21 {strides = array<i32>} : memref<16x128xf32, #tpu.memory_space<vmem>>, vector<16x128xf32>,
    %23 = vector.extract_strided_slice %8 {offsets = [2, 0], sizes = [16, 72], strides = [1, 1]} : vector<24x72xf32> to vector<16x72xf32>
    %c0_23 = arith.constant 0 : index
    %c0_24 = arith.constant 0 : index
    %24 = vector.load %arg7[%c0_23, %c0_24] : memref<16x128xf32, #tpu.memory_space<vmem>>, vector<16x128xf32>
    %c2 = arith.constant 2 : index
    %c0_25 = arith.constant 0 : index
    %c0_26 = arith.constant 0 : index
    %25 = vector.load %arg4[%c2, %c0_25, %c0_26] : memref<3x72x128xf32, #tpu.memory_space<vmem>>, vector<1x72x128xf32>
    %26 = vector.shape_cast %25 : vector<1x72x128xf32> to vector<72x128xf32>
    %cst_27 = arith.constant dense<0.000000e+00> : vector<16x128xf32>
    %27 = tpu.matmul %23, %26, %cst_27 {dimension_numbers = #tpu.dot_dimension_numbers<[1], [0], [0], [1], [0, 0, 1, 1], [], []>} : vector<16x72xf32>, vector<72x128xf32>, vector<16x128xf32> -> vector<16x128xf32>
    %28 = arith.addf %24, %27 : vector<16x128xf32>
    %c0_28 = arith.constant 0 : index
    %c0_29 = arith.constant 0 : index
    %29 = vector.load %arg7[%c0_28, %c0_29] : memref<16x128xf32, #tpu.memory_space<vmem>>, vector<16x128xf32>
    tpu.vector_store %arg7[%c0_28, %c0_29], %28 {strides = array<i32>} : memref<16x128xf32, #tpu.memory_space<vmem>>, vector<16x128xf32>,
    %c0_30 = arith.constant 0 : index
    %c0_31 = arith.constant 0 : index
    %30 = vector.load %arg7[%c0_30, %c0_31] : memref<16x128xf32, #tpu.memory_space<vmem>>, vector<16x128xf32>
    %cst_32 = arith.constant 0.000000e+00 : f32
    %31 = vector.broadcast %cst_32 : f32 to vector<16x128xf32>
    %32 = arith.cmpf oge, %30, %31 : vector<16x128xf32>
    %cst_33 = arith.constant 2.000000e-01 : f32
    %33 = vector.broadcast %cst_33 : f32 to vector<16x128xf32>
    %34 = arith.mulf %33, %30 : vector<16x128xf32>
    %35 = arith.select %32, %30, %34 : vector<16x128xi1>, vector<16x128xf32>
    %c0_34 = arith.constant 0 : index
    %c0_35 = arith.constant 0 : index
    %c0_36 = arith.constant 0 : index
    %36 = vector.load %arg6[%c0_34, %c0_35, %c0_36] : memref<1x16x128xf32, #tpu.memory_space<vmem>>, vector<1x16x128xf32>
    %37 = vector.shape_cast %36 : vector<1x16x128xf32> to vector<16x128xf32>
    %38 = vector.shape_cast %35 : vector<16x128xf32> to vector<1x16x128xf32>
    tpu.vector_store %arg6[%c0_34, %c0_35, %c0_36], %38 {strides = array<i32>} : memref<1x16x128xf32, #tpu.memory_space<vmem>>, vector<1x16x128xf32>,
    return
  }
  func.func @transform_0(%arg0: i32, %arg1: i32) -> (i32, i32, i32) {
    %c0_i32 = arith.constant 0 : i32
    %c0_i32_0 = arith.constant 0 : i32
    return %arg0, %arg1, %c0_i32 : i32, i32, i32
  }
  func.func @transform_1(%arg0: i32, %arg1: i32) -> (i32, i32, i32) {
    %c1_i32 = arith.constant 1 : i32
    %0 = arith.addi %arg1, %c1_i32 : i32
    %c2_i32 = arith.constant 2 : i32
    %1 = arith.muli %0, %c2_i32 : i32
    %c0_i32 = arith.constant 0 : i32
    %c0_i32_0 = arith.constant 0 : i32
    return %arg0, %1, %c0_i32 : i32, i32, i32
  }
  func.func @transform_2(%arg0: i32, %arg1: i32) -> (i32, i32, i32) {
    %c0_i32 = arith.constant 0 : i32
    %c0_i32_0 = arith.constant 0 : i32
    %c0_i32_1 = arith.constant 0 : i32
    %c0_i32_2 = arith.constant 0 : i32
    return %c0_i32, %c0_i32_0, %c0_i32_1 : i32, i32, i32
  }
  func.func @transform_3(%arg0: i32, %arg1: i32) -> (i32, i32) {
    %c0_i32 = arith.constant 0 : i32
    %c0_i32_0 = arith.constant 0 : i32
    %c0_i32_1 = arith.constant 0 : i32
    return %c0_i32, %c0_i32_0 : i32, i32
  }
  func.func @transform_4(%arg0: i32, %arg1: i32) -> (i32, i32, i32) {
    %c0_i32 = arith.constant 0 : i32
    %c0_i32_0 = arith.constant 0 : i32
    return %arg0, %arg1, %c0_i32 : i32, i32, i32
  }
}

</mosaic_0001>

<bundles_post_ra>
// kernel: tpu_custom_call.1
= control target key start
LH: loop header
LB: loop body
LE: loop exit
PB: predicated region body
PF: predicated region fallthrough
CT: control target
= control target key end

     0   :  { %s1525_s0 = inlined_call_operand.hbm [shape: f32[2,32,72], index: 0, kind: input, shape index: {}]   ;;  %s1526_s1 = inlined_call_operand.hbm [shape: f32[2,32,72], index: 1, kind: input, shape index: {}]   ;;  %s1527_s2 = inlined_call_operand.hbm [shape: f32[3,72,128], index: 2, kind: input, shape index: {}]   ;;  %s1528_s3 = inlined_call_operand.vmem [shape: f32[1,128], index: 3, kind: input, shape index: {}]   ;;  %s1529_s4 = inlined_call_operand.hbm [shape: f32[2,16,128], index: 4, kind: output, shape index: {}]  }
   0x1   :  { %1539 = sst [smem:[#allocation17_spill]] %s1525_s0 }
   0x2   :  { %1540 = sst [smem:[#allocation18_spill]] %s1527_s2 }
   0x3   :  { %9 = vsyncpa [#allocation4], 0 }
   0x4   :  { %11 = vsyncpa [#allocation4 + $0x1], 0 }
   0x5   :  { %12 = vsyncpa [#allocation7], 0 }
   0x6   :  { %14 = vsyncpa [#allocation7 + $0x1], 0 }
   0x7   :  { %15 = vsyncpa [#allocation5], 0 }
   0x8   :  { %17 = vsyncpa [#allocation5 + $0x1], 0  ;;  %s1237_s15 = smov 0   ;;  %s1239_s16 = smov 0  }
   0x9   :  { %s1241_s17 = smov 0   ;;  %s1243_s18 = smov 0  }
   0xa   :  { %s1245_s19 = smov 0   ;;  %s1247_s20 = smov 0  }
   0xb LB: > { %1541 = sst [smem:[#allocation14_spill]] %s1190_s17  ;;  %s1268_s21 = sadd.s32 4294967295, %s1202_s20   ;;  %s1202_s20 = sphi %s1247_s20, %s23_s20   ;;  %s1198_s19 = sphi %s1245_s19, %s1571_s19   ;;  %s1194_s18 = sphi %s1243_s18, %s1570_s18   ;;  %s1190_s17 = sphi %s1241_s17, %s1566_s17   ;;  %s1186_s16 = sphi %s1239_s16, %s1569_s16   ;;  %s1182_s15 = sphi %s1237_s15, %s1568_s15  }
   0xc   : > { %s761_s22 = sadd.s32 4294967294, %s1202_s20   ;;  %p57_p0 = scmp.ne.s32.totalorder %s1186_s16, %s1182_s15 }
   0xd   : > { %p1530_p1 = scmp.eq.s32.totalorder %s1268_s21, 0  ;;  %p163_p3 = scmp.eq.s32.totalorder %s761_s22, 1 }
   0xe   : > { %p762_p5 = scmp.ge.s32.totalorder %s1202_s20, 1  ;;  %p170_p7 = scmp.lt.s32.totalorder %s1202_s20, 3 }
   0xf   : > { %p1277_p4 = por %p1530_p1, %p57_p0  ;;  %p1282_p6 = por %p163_p3, %p57_p0 }
  0x10   : > { %p1287_p8 = pnand %p762_p5, %p170_p7  ;;  %s1204_s26 = smov [#allocation8]  }
  0x11   : > { %s1542_s23 = scalar_select %p1277_p4, 1, 0 }
  0x12   : > { %s1543_s24 = scalar_select %p1282_p6, 1, 0 }
  0x13   : > { %s1544_s25 = scalar_select %p1287_p8, 1, 0 }
  0x14   : > { %s182_s27 = sshll.u32 %s1204_s26, 4  ;;  %p951_p9 = pneg %p1287_p8  ;;  %s183_s27 = int_to_ptr.vmem [resolvable:$true] %s182_s27 }
  0x15   : > { %s35_s29 = sadd.s32 1, %s1198_s19  ;;  %s1546_s2 = sld [smem:[#allocation18_spill]] }
  0x16   : > { %p1296_p11 = pnand %p951_p9, %p1530_p1 }
  0x18   : > { %p1025_p13 = pneg %p1296_p11 }
  0x1b   : > { %s1023_s6 = scalar_lea.hbm %s1546_s2, 3456 }
  0x1c   : > { %p1024_p12 = scmp.ne.s32.totalorder %s1546_s2, %s1023_s6  ;;  %p1030_p5 = scmp.lt.u32.totalorder %s1023_s6, %s1546_s2 }
  0x1e   : > { %p1026_p0 = pnand %p1025_p13, %p1024_p12 }
  0x20   : > { %p1027_p3 = pneg %p1026_p0 }
  0x22   : > { %p1032_p7 = pnand %p1030_p5, %p1027_p3 }
  0x24   : > { %1035 = shalt.err (!%p1032_p7)
}
  0x25   : > { %s1036_s11 = scalar_lea.vmem %s183_s27, 3456  ;;  %p1044_p2 = scmp.lt.s32.totalorder %s183_s27, %s183_s27 }
  0x26   : > { %p1037_p9 = scmp.ne.s32.totalorder %s183_s27, %s1036_s11  ;;  %p1045_p6 = scmp.lt.s32.totalorder %s1036_s11, %s1036_s11 }
  0x28   : > { %p1039_p10 = pnand %p1037_p9, %p1025_p13  ;;  %p1046_p4 = por %p1045_p6, %p1044_p2 }
  0x2a   : > { %p1040_p1 = pneg %p1039_p10 }
  0x2c   : > { %p1047_p8 = pnand %p1046_p4, %p1040_p1 }
  0x2e   : > { %1050 = shalt.err (!%p1047_p8)
}
  0x2f   : > { %s1533_s12 = smov 128   ;;  %s1535_s13 = smov 8  }
  0x30   : > { %954 = dma.hbm_to_vmem [thread:$0]  (!%p1296_p11), %s1546_s2, 3456, %s183_s27, [#allocation7], %s1533_s12, %s1533_s12, %s1535_s13  }
  0x31   : > { %p37_p1 = scmp.ge.s32.totalorder %s35_s29, 2  ;;  %s44_s26 = sadd.s32 1, %s1190_s17 }
  0x32   : > { %p51_p2 = scmp.ne.s32.totalorder %s1190_s17, %s1186_s16  ;;  %p52_p4 = scmp.eq.s32.totalorder %s1202_s20, 0 }
  0x33   : > { %s1573_s29 = smov (%p37_p1, %s35_s29), 0  ;;  %p1549_p8 = scmp.eq.s32.totalorder %s1268_s21, 1 }
  0x34   : > { %1547 = sst [smem:[#allocation15_spill]] %s1573_s29  ;;  %p1326_p6 = por %p52_p4, %p51_p2 }
  0x35   : > { %p1332_p10 = por %p1549_p8, %p51_p2  ;;  %s39_s5 = ssub.s32 %s1198_s19, %s1573_s29 }
  0x36   : > { %p967_p11 = scmp.lt.s32.totalorder %s1202_s20, 2  ;;  %p42_p12 = scmp.eq.s32.totalorder %s39_s5, 0 }
  0x37   : > { %s1550_s28 = scalar_select %p1332_p10, 1, 0 }
  0x38   : > { %s1340_s27 = sand.u32 1, %s1190_s17   ;;  %s1534_s8 = sshll.u32 %s1198_s19, 9 }
  0x39   : > { %s765_s6 = sshll.u32 %s1340_s27, 4  ;;  %s1552_s0 = sld [smem:[#allocation17_spill]] }
  0x3a   : > { %s1344_s7 = scalar_select %p42_p12, %s1190_s17, %s44_s26  }
  0x3b   : > { %s203_s14 = scalar_lea.vmem [#allocation3], %s765_s6  ;;  %p1358_p13 = pnand %p967_p11, %p1326_p6 }
  0x3c   : > { %1551 = sst [smem:[#allocation16_spill]] %s1344_s7  ;;  %s212_s22 = sshll.u32 %s203_s14, 4  ;;  %s1354_s22 = int_to_ptr.vmem [resolvable:$true] %s212_s22 }
  0x3d   : > { %s768_s12 = sshll.u32 %s1340_s27, 3  ;;  %s200_s9 = scalar_lea.sflag [#allocation4], %s1340_s27 }
  0x3e   : > { %p1053_p3 = pneg %p1358_p13 }
  0x3f   : > { %s1352_s11 = scalar_lea.hbm %s1552_s0, %s1534_s8  ;;  %s1056_s30 = scalar_lea.hbm %s1552_s0, 1024 }
  0x40   : > { %s1051_s10 = scalar_lea.hbm %s1352_s11, 256  ;;  %p1057_p9 = scmp.lt.u32.totalorder %s1352_s11, %s1552_s0 }
  0x41   : > { %p1052_p0 = scmp.ne.s32.totalorder %s1352_s11, %s1051_s10  ;;  %p1058_p1 = scmp.lt.u32.totalorder %s1056_s30, %s1051_s10 }
  0x42   : > { %p1060_p4 = scmp.lt.u32.totalorder %s1051_s10, %s1352_s11 }
  0x43   : > { %p1054_p5 = pnand %p1053_p3, %p1052_p0  ;;  %p1059_p2 = por %p1058_p1, %p1057_p9 }
  0x45   : > { %p1055_p7 = pneg %p1054_p5  ;;  %p1061_p6 = por %p1060_p4, %p1059_p2 }
  0x47   : > { %p1062_p8 = pnand %p1061_p6, %p1055_p7 }
  0x49   : > { %1065 = shalt.err (!%p1062_p8)
}
  0x4a   : > { %s1066_s26 = scalar_lea.vmem %s1354_s22, 256  ;;  %s1207_s6 = smov [#allocation3]  }
  0x4b   : > { %p1067_p11 = scmp.ne.s32.totalorder %s1354_s22, %s1066_s26  ;;  %s1071_s14 = sshll.u32 %s1207_s6, 4  ;;  %s1072_s14 = int_to_ptr.vmem [resolvable:$false] %s1071_s14 }
  0x4c   : > { %s1073_s13 = scalar_lea.vmem %s1072_s14, 512  ;;  %p1074_p5 = scmp.lt.s32.totalorder %s1354_s22, %s1072_s14 }
  0x4d   : > { %p1069_p12 = pnand %p1067_p11, %p1053_p3  ;;  %p1075_p9 = scmp.lt.s32.totalorder %s1073_s13, %s1066_s26 }
  0x4f   : > { %p1070_p0 = pneg %p1069_p12  ;;  %p1076_p1 = por %p1075_p9, %p1074_p5 }
  0x51   : > { %p1077_p2 = pnand %p1076_p1, %p1070_p0 }
  0x53   : > { %1080 = shalt.err (!%p1077_p2)
}
  0x54   : > { %s1554_s8 = smov 8   ;;  %s1555_s10 = smov 128  }
  0x55   : > { %958 = dma.hbm_to_vmem [thread:$0]  (!%p1358_p13), %s1352_s11, 256, %s1354_s22, %s200_s9, %s1555_s10, %s1555_s10, %s1554_s8  }
  0x56   : > { %s1556_s30 = sshll.u32 %s1198_s19, 9  ;;  %s226_s0 = scalar_lea.vmem [#allocation6], %s768_s12 }
  0x57   : > { %s682_s14 = scalar_lea.hbm %s1526_s1, %s1556_s30  ;;  %s237_s2 = sshll.u32 %s226_s0, 4  ;;  %s238_s2 = int_to_ptr.vmem [resolvable:$true] %s237_s2 }
  0x58   : > { %s1400_s13 = scalar_lea.hbm %s682_s14, 256  ;;  %s1557_s29 = sand.u32 1, %s1202_s20  }
  0x59   : > { %s223_s7 = scalar_lea.sflag [#allocation7], %s1557_s29  ;;  %s1111_s17 = scalar_lea.hbm %s682_s14, 384 }
  0x5a   : > { %p1082_p7 = scmp.ne.s32.totalorder %s1400_s13, %s1111_s17  ;;  %s1086_s9 = scalar_lea.hbm %s1526_s1, 1024 }
  0x5b   : > { %p1087_p8 = scmp.lt.u32.totalorder %s1400_s13, %s1526_s1  ;;  %p1088_p11 = scmp.lt.u32.totalorder %s1086_s9, %s1111_s17 }
  0x5c   : > { %p1084_p4 = pnand %p1082_p7, %p1053_p3  ;;  %p1090_p0 = scmp.lt.u32.totalorder %s1111_s17, %s1400_s13 }
  0x5d   : > { %p1089_p12 = por %p1088_p11, %p1087_p8 }
  0x5e   : > { %p1085_p6 = pneg %p1084_p4 }
  0x5f   : > { %p1091_p5 = por %p1090_p0, %p1089_p12 }
  0x61   : > { %p1092_p9 = pnand %p1091_p5, %p1085_p6 }
  0x63   : > { %1095 = shalt.err (!%p1092_p9)
}
  0x64   : > { %s1096_s0 = scalar_lea.vmem %s238_s2, 128  ;;  %s1208_s29 = smov [#allocation6]  }
  0x65   : > { %p1097_p1 = scmp.ne.s32.totalorder %s238_s2, %s1096_s0  ;;  %s1101_s12 = sshll.u32 %s1208_s29, 4  ;;  %s1102_s12 = int_to_ptr.vmem [resolvable:$false] %s1101_s12 }
  0x66   : > { %s1103_s10 = scalar_lea.vmem %s1102_s12, 256  ;;  %p1104_p4 = scmp.lt.s32.totalorder %s238_s2, %s1102_s12 }
  0x67   : > { %p1099_p2 = pnand %p1097_p1, %p1053_p3  ;;  %p1105_p10 = scmp.lt.s32.totalorder %s1103_s10, %s1096_s0 }
  0x69   : > { %p1100_p7 = pneg %p1099_p2  ;;  %p1106_p8 = por %p1105_p10, %p1104_p4 }
  0x6b   : > { %p1107_p11 = pnand %p1106_p8, %p1100_p7 }
  0x6d   : > { %1110 = shalt.err (!%p1107_p11)
}
  0x6e   : > { %961 = dma.hbm_to_vmem [thread:$0]  (!%p1358_p13), %s1400_s13, 128, %s238_s2, %s223_s7  }
  0x6f   : > { %p1558_p6 = scmp.ne.s32.totalorder %s1544_s25, 0 }
  0x70   : > { %s1427_s17 = sand.u32 (!%p1558_p6), 1, %s1186_s16   ;;  %p1559_p10 = scmp.ne.s32.totalorder (!%p1558_p6), %s1542_s23, 0 }
  0x71   : > { %246 = sbr.rel (%p1558_p6) target bundleno = 399 (0x18f), region = 36  ;;  %s772_s30 = sshll.u32 (!%p1558_p6), %s1427_s17, 4 }
  0x72   : > { %s249_s6 = scalar_lea.sflag (!%p1558_p6), [#allocation4], %s1427_s17  ;;  %s252_s26 = scalar_lea.vmem (!%p1558_p6), [#allocation3], %s772_s30 }
  0x78   : > { %1165 = dma.done.wait (%p1559_p10), %s249_s6, 256  }
  0x79   : > { %1167 = vsyncadd (%p1559_p10), %s249_s6, 4294967040  ;;  %s257_s2 = sand.u32 1, %s1268_s21   ;;  %s773_s25 = sshll.u32 %s1427_s17, 3 }
  0x7a   : > { %s258_s7 = scalar_lea.sflag [#allocation7], %s257_s2  ;;  %s1439_s5 = scalar_lea.vmem [#allocation6], %s773_s25 }
  0x7b   : > { %1169 = dma.done.wait (%p1559_p10), %s258_s7, 128  }
  0x7c   : > { %1171 = vsyncadd (%p1559_p10), %s258_s7, 4294967168  ;;  %p1560_p13 = scmp.eq.s32.totalorder %s1268_s21, 0 }
  0x7e   : > { %1173 = dma.done.wait (%p1560_p13), [#allocation7], 3456   ;;  %p1561_p3 = pmov %p1560_p13 }
  0x7f   : > { %v411_v0 = vld [vmem:[#allocation8 + $0x48] sm:$0xff]  ;;  %v412_v1 = vld [vmem:[#allocation8 + $0x50] sm:$0xff]  ;;  %v413_v2 = vld [vmem:[#allocation8 + $0x58] sm:$0xff]  ;;  %vm322_vm0 = vcmask 588800   ;;  %vm421_vm1 = vcmask 1046528   ;;  %vm522_vm2 = vcmask 1045504  }
  0x80   : > { %1175 = vsyncadd (%p1561_p3), [#allocation7], 4294963840  ;;  %v903_v3 = vpack.c.bf16 %v412_v1, %v411_v0  ;;  %v414_v4 = vld [vmem:[#allocation8 + $0x60] sm:$0xff]  ;;  %v415_v6 = vld [vmem:[#allocation8 + $0x68] sm:$0xff]  ;;  %s294_s14 = scalar_lea.vmem [#allocation9], %s772_s30  ;;  %s790_s11 = sshll.u32 %s1194_s18, 8 }
  0x81   : > { %v907_v5 = vpack.c.bf16 %v414_v4, %v413_v2  ;;  %v416_v7 = vld [vmem:[#allocation8 + $0x70] sm:$0xff]  ;;  %v313_v8 = vld [vmem:[#allocation8] sm:$0xff]  ;;  %v314_v9 = vld [vmem:[#allocation8 + $0x8] sm:$0xff]  ;;  %s637_s13 = sshll.u32 %s294_s14, 4  ;;  %s1476_s8 = scalar_lea.hbm %s1529_s4, %s790_s11  ;;  %s1471_s13 = int_to_ptr.vmem [resolvable:$true] %s637_s13 }
  0x82   : > { %904 = vmatprep.subr.bf16.mxu0 %v903_v3  ;;  %v308_v10 = vld [vmem:[%s252_s26] sm:$0xff]  ;;  %v887_v11 = vpack.c.bf16 %v314_v9, %v313_v8  ;;  %v1449_v12 = vld [vmem:[%s252_s26 + $0x8] sm:$0xff]  ;;  %v911_v14 = vpack.c.bf16 %v416_v7, %v415_v6  ;;  %s622_s18 = scalar_lea.sflag [#allocation5], %s1427_s17  ;;  %s1112_s27 = scalar_lea.vmem %s1471_s13, 256 }
  0x83   : > { %906 = vmatpush3.bf16.msra.mxu0 %v903_v3  ;;  %v422_v13 = vrot.slane %v308_v10, 1  ;;  %842 = vmatprep.mubr.msk.f32.mxu1 %vm322_vm0, %v308_v10  ;;  %v423_v15 = vrot.slane %v1449_v12, 1  ;;  %v315_v16 = vld [vmem:[#allocation8 + $0x10] sm:$0xff]  ;;  %v316_v17 = vld [vmem:[#allocation8 + $0x18] sm:$0xff]  ;;  %v418_v19 = vld [vmem:[#allocation8 + $0x80] sm:$0xff]  ;;  %v523_v34 = vrot.slane %v308_v10, 2  ;;  %p1113_p12 = scmp.ne.s32.totalorder %s1471_s13, %s1112_s27 }
  0x84   : > { %908 = vmatprep.subr.bf16.mxu0 %v907_v5  ;;  %v417_v18 = vld [vmem:[#allocation8 + $0x78] sm:$0xff]  ;;  %888 = vmatprep.subr.bf16.mxu1 %v887_v11  ;;  %v891_v20 = vpack.c.bf16 %v316_v17, %v315_v16  ;;  %v317_v21 = vld [vmem:[#allocation8 + $0x20] sm:$0xff]  ;;  %v318_v23 = vld [vmem:[#allocation8 + $0x28] sm:$0xff]  ;;  %v524_v35 = vrot.slane %v1449_v12, 2  ;;  %p1562_p0 = scmp.ne.s32.totalorder %s1550_s28, 0  ;;  %s1209_s0 = smov [#allocation9]  }
  0x85   : > { %890 = vmatpush3.bf16.msra.mxu1 %v887_v11  ;;  %v424_v22 = vsel %vm421_vm1, %v422_v13, %v423_v15  ;;  %v895_v24 = vpack.c.bf16 %v318_v23, %v317_v21  ;;  %v915_v25 = vpack.c.bf16 %v418_v19, %v417_v18  ;;  %v319_v26 = vld [vmem:[#allocation8 + $0x30] sm:$0xff]  ;;  %v320_v27 = vld [vmem:[#allocation8 + $0x38] sm:$0xff]  ;;  %v419_v30 = vld [vmem:[#allocation8 + $0x88] sm:$0xff]  ;;  %s1116_s29 = sshll.u32 %s1209_s0, 4  ;;  %s1117_s29 = int_to_ptr.vmem [resolvable:$false] %s1116_s29 }
  0x86   : > { %863 = vmatprep.mubr.msk.f32.mxu0 %vm322_vm0, %v424_v22  ;;  %892 = vmatprep.subr.bf16.mxu1 %v891_v20  ;;  %v310_v28 = vld [vmem:[%s1439_s5] sm:$0xff]  ;;  %v899_v29 = vpack.c.bf16 %v320_v27, %v319_v26  ;;  %v515_v36 = vld [vmem:[#allocation8 + $0xa0] sm:$0xff]  ;;  %v516_v37 = vld [vmem:[#allocation8 + $0xa8] sm:$0xff]  ;;  %v525_v42 = vsel %vm522_vm2, %v523_v34, %v524_v35  ;;  %p1114_p5 = pnand %p1113_p12, %p1562_p0  ;;  %s1118_s12 = scalar_lea.vmem %s1117_s29, 512 }
  0x87   : > { %910 = vmatpush3.bf16.msra.mxu0 %v907_v5  ;;  %v513_v31 = vld [vmem:[#allocation8 + $0x90] sm:$0xff]  ;;  %v514_v32 = vld [vmem:[#allocation8 + $0x98] sm:$0xff]  ;;  %v425_v33 = vrot.slane %v310_v28, 1  ;;  %v321_v39 = vld [vmem:[#allocation8 + $0x40] sm:$0xff]  ;;  %v923_v41 = vpack.c.bf16 %v516_v37, %v515_v36  ;;  %v526_v49 = vrot.slane %v310_v28, 2  ;;  %p1119_p1 = scmp.lt.s32.totalorder %s1471_s13, %s1117_s29  ;;  %p1120_p2 = scmp.lt.s32.totalorder %s1118_s12, %s1112_s27 }
  0x88   : > { %912 = vmatprep.subr.bf16.mxu0 %v911_v14  ;;  %v919_v38 = vpack.c.bf16 %v514_v32, %v513_v31  ;;  %v517_v43 = vld [vmem:[#allocation8 + $0xb0] sm:$0xff]  ;;  %v518_v44 = vld [vmem:[#allocation8 + $0xb8] sm:$0xff]  ;;  %v519_v46 = vld [vmem:[#allocation8 + $0xc0] sm:$0xff]  ;;  %p1115_p9 = pneg %p1114_p5 }
  0x89   : > { %894 = vmatpush3.bf16.msra.mxu1 %v891_v20  ;;  %v426_v40 = vsel %vm421_vm1, %v423_v15, %v425_v33  ;;  %v927_v45 = vpack.c.bf16 %v518_v44, %v517_v43  ;;  %v520_v47 = vld [vmem:[#allocation8 + $0xc8] sm:$0xff]  ;;  %v521_v50 = vld [vmem:[#allocation8 + $0xd0] sm:$0xff]  ;;  %v527_v51 = vsel %vm522_vm2, %v524_v35, %v526_v49  ;;  %p1121_p7 = por %p1120_p2, %p1119_p1 }
  0x8a   : > { %896 = vmatprep.subr.bf16.mxu1 %v895_v24  ;;  %v931_v48 = vpack.c.bf16 %v520_v47, %v519_v46  ;;  %v776_v54 = vld [vmem:[%s1528_s3] ss:$0 sm:$0xff] }
  0x8b   : > { %914 = vmatpush3.bf16.msra.mxu0 %v911_v14  ;;  %p1122_p4 = pnand %p1121_p7, %p1115_p9 }
  0x8c   : > { %916 = vmatprep.subr.bf16.mxu0 %v915_v25 }
  0x8d   : > { %898 = vmatpush3.bf16.msra.mxu1 %v895_v24 }
  0x8e   : > { %900 = vmatprep.subr.bf16.mxu1 %v899_v29 }
  0x8f   : > { %918 = vmatpush3.bf16.msra.mxu0 %v915_v25 }
  0x90   : > { %861 = vmatprep.subr.mxu0 %v419_v30 }
  0x91   : > { %902 = vmatpush3.bf16.msra.mxu1 %v899_v29 }
  0x92   : > { %840 = vmatprep.subr.mxu1 %v321_v39 }
  0x93   : > { %862 = vmatpush3.msra.mxu0 %v419_v30 }
  0x94   : > { %920 = vmatprep.subr.bf16.mxu0 %v919_v38  ;;  %864 = vmatmul.mubr.msk.f32.vlgmr.msra.gmra.mrb[0].mxu0 %vm322_vm0, %v426_v40 }
  0x95   : > { %922 = vmatpush3.bf16.msra.mxu0 %v919_v38  ;;  %884 = vmatprep.mubr.msk.f32.mxu0 %vm322_vm0, %v525_v42 }
  0x96   : > { %924 = vmatprep.subr.bf16.mxu0 %v923_v41  ;;  %841 = vmatpush3.msra.mxu1 %v321_v39 }
  0x97   : > { %843 = vmatmul.mubr.msk.f32.vlgmr.msra.gmra.mrb[0].mxu1 %vm322_vm0, %v1449_v12 }
  0x99   : > { %926 = vmatpush3.bf16.msra.mxu0 %v923_v41 }
  0x9a   : > { %928 = vmatprep.subr.bf16.mxu0 %v927_v45 }
  0x9d   : > { %930 = vmatpush3.bf16.msra.mxu0 %v927_v45 }
  0x9e   : > { %932 = vmatprep.subr.bf16.mxu0 %v931_v48 }
  0xa1   : > { %934 = vmatpush3.bf16.msra.mxu0 %v931_v48 }
  0xa2   : > { %882 = vmatprep.subr.mxu0 %v521_v50 }
  0xa5   : > { %883 = vmatpush3.msra.mxu0 %v521_v50 }
  0xa6   : > { %885 = vmatmul.mubr.msk.f32.vlgmr.msra.gmra.mrb[0].mxu0 %vm322_vm0, %v527_v51 }
 0x16a   : > { %v844_v52 = vpop.f32.mrb[0].mxu1 }
 0x16b   : > { %v395_v53 = vpop.f32.mrb[1].mxu1  ;;  %v405_v55 = vadd.f32 %v844_v52, %v776_v54 }
 0x16c   : > { %v404_v56 = vadd.f32 %v776_v54, %v395_v53 }
 0x179   : > { %v886_v57 = vpop.f32.mrb[0].mxu0 }
 0x17a   : > { %v936_v58 = vadd.f32 %v886_v57, %v405_v55  ;;  %v598_v59 = vpop.f32.mrb[1].mxu0 }
 0x17b   : > { %v938_v60 = vadd.f32 %v598_v59, %v404_v56 }
 0x17c   : > { %vm614_vm3 = vcmp.ge.f32.partialorder %v936_v58, 0.0  ;;  %v616_v61 = vmul.f32 0.2, %v936_v58 }
 0x17d   : > { %vm613_vm4 = vcmp.ge.f32.partialorder %v938_v60, 0.0  ;;  %v615_v62 = vmul.f32 0.2, %v938_v60 }
 0x17e   : > { %v618_v63 = vsel %vm614_vm3, %v936_v58, %v616_v61 }
 0x17f   : > { %620 = vst [vmem:[%s294_s14 + $0x8] sm:$0xff] %v618_v63  ;;  %v617_v0 = vsel %vm613_vm4, %v938_v60, %v615_v62 }
 0x180   : > { %619 = vst [vmem:[%s294_s14] sm:$0xff] %v617_v0 }
 0x181   : > { %1125 = shalt.err (!%p1122_p4)
}
 0x182   : > { %s1126_s10 = scalar_lea.hbm %s1476_s8, 256  ;;  %s1130_s26 = scalar_lea.hbm %s1529_s4, 512 }
 0x183   : > { %p1127_p8 = scmp.ne.s32.totalorder %s1476_s8, %s1126_s10  ;;  %p1131_p10 = scmp.lt.u32.totalorder %s1476_s8, %s1529_s4 }
 0x184   : > { %p1132_p13 = scmp.lt.u32.totalorder %s1130_s26, %s1126_s10  ;;  %p1134_p12 = scmp.lt.u32.totalorder %s1126_s10, %s1476_s8 }
 0x185   : > { %p1128_p11 = pnand %p1127_p8, %p1562_p0 }
 0x186   : > { %p1133_p3 = por %p1132_p13, %p1131_p10 }
 0x187   : > { %p1129_p6 = pneg %p1128_p11 }
 0x188   : > { %p1135_p5 = por %p1134_p12, %p1133_p3 }
 0x18a   : > { %p1136_p9 = pnand %p1135_p5, %p1129_p6 }
 0x18c   : > { %1139 = shalt.err (!%p1136_p9)
}
 0x18d   : > { %s1210_s7 = smov 128   ;;  %s1211_s5 = smov 8  }
 0x18e   : > { %949 = dma.vmem_to_hbm [thread:$0]  (%p1562_p0), %s1471_s13, 256, %s1476_s8, %s622_s18, %s1210_s7, %s1210_s7, %s1211_s5  }
 0x18f PF: > { %s652_s21 = sand.u32 1, %s1182_s15   ;;  %p1563_p1 = scmp.ne.s32.totalorder %s1543_s24, 0 }
 0x190   : > { %p1564_p2 = scmp.ge.s32.totalorder %s1202_s20, 2  ;;  %s653_s23 = scalar_lea.sflag [#allocation5], %s652_s21 }
 0x192   : > { %p963_p7 = pnand %p1564_p2, %p1563_p1 }
 0x194   : > { %1177 = dma.done.wait (!%p963_p7), %s653_s23, 256  }
 0x195   : > { %1179 = vsyncadd (!%p963_p7), %s653_s23, 4294967040  ;;  %s23_s20 = sadd.s32 1, %s1202_s20   ;;  %s1565_s14 = sld [smem:[#allocation14_spill]] }
 0x196   : > { %p20_p4 = scmp.ge.s32.totalorder %s23_s20, 4   ;;  %s1566_s17 = sld [smem:[#allocation16_spill]] }
 0x197   : > { %s1567_s28 = sld [smem:[#allocation15_spill]]  ;;  %s1568_s15 = smov %s1186_s16 }
 0x198   : > { %s1570_s18 = smov %s1198_s19  ;;  %22 = sbr.rel (!%p20_p4) target bundleno = 11 (0xb), region = 100 }
 0x19b   : > { %s1569_s16 = smov %s1565_s14 }
 0x19d   : > { %s1571_s19 = smov %s1567_s28 }
 0x19f   :  { %658 = vsyncpa [#allocation4], 1 }
 0x1a0   :  { %660 = vsyncpa [#allocation4 + $0x1], 1 }
 0x1a1   :  { %661 = vsyncpa [#allocation7], 1 }
 0x1a2   :  { %663 = vsyncpa [#allocation7 + $0x1], 1 }
 0x1a3   :  { %664 = vsyncpa [#allocation5], 1 }
 0x1a4   :  { %666 = vsyncpa [#allocation5 + $0x1], 1 }

</bundles_post_ra>
